<compile_context>
chip_gen: v6e
topology: v6e:2x2x1
jax: 0.10.0
libtpu: 0.0.40
codegen_flags: <defaults>
</compile_context>

<pallas_src>
import jax
import jax.numpy as jnp
from jax.experimental import pallas as pl
from jax.experimental.pallas import tpu as pltpu


_TARGET_BLOCK_BYTES = 1 << 20  # ~1 MiB per pipelined block


def _round_up(x, m):
    return ((x + m - 1) // m) * m


def _make_pool_gate_kernel(S, S_TILE, C):
    inv_s = 1.0 / float(S)          # divide by the TRUE spatial size, not padded
    need_mask = (S % S_TILE) != 0   # static: only emit masking code if a tail exists

    def kernel(x_ref, w_ref, b_ref, gate_ref, acc_ref):
        # x_ref   : (1, C, S_TILE) input tile for one batch element
        # w_ref   : (C, C) conv3d 1x1x1 weight w[c_out, c_in]   (resident across grid)
        # b_ref   : (C, 1) conv3d bias                           (resident across grid)
        # gate_ref: (1, C, 1) sigmoid gate output (written on last S step only)
        # acc_ref : (C, 1) f32 running spatial sum (VMEM scratch)
        s_idx = pl.program_id(1)

        @pl.when(s_idx == 0)
        def _init():
            acc_ref[...] = jnp.zeros_like(acc_ref)

        x = x_ref[0]                                      # (C, S_TILE), input dtype
        if need_mask:
            lane = jax.lax.broadcasted_iota(jnp.int32, x.shape, 1)
            valid = (s_idx * S_TILE + lane) < S
            x = jnp.where(valid, x, jnp.zeros_like(x))    # mask OOB tail, keep narrow dtype
        # accumulate in f32 without binding an f32 copy of the whole tile
        acc_ref[...] += jnp.sum(x, axis=1, keepdims=True, dtype=jnp.float32)

        @pl.when(s_idx == pl.num_programs(1) - 1)
        def _finalize():
            mean = acc_ref[...] * inv_s                   # (C, 1)
            # 1x1x1 conv on pooled vector: g[o] = sum_i w[o, i] * mean[i] + b[o]
            # (C is tiny -> broadcast-multiply + lane reduce; no degenerate MXU matmul)
            g = jnp.sum(w_ref[...] * mean.T, axis=1, keepdims=True) + b_ref[...]
            gate_ref[...] = jax.nn.sigmoid(g)[None]       # (1, C, 1)

    return kernel


def _scale_kernel(gate_ref, x_ref, o_ref):
    # gate_ref: (R_TILE, 1) f32 gate, one scalar per (batch, channel) row
    # x_ref   : (R_TILE, S_TILE) input tile
    # o_ref   : (R_TILE, S_TILE) output tile
    # Cast the gate, not the tile: multiply/store stay in the input dtype.
    o_ref[...] = x_ref[...] * gate_ref[...].astype(o_ref.dtype)


def simplified_channel_attention(x, w, b):
    """x: (B, C, D, H, W); w: (C, C) 1x1x1 conv weight; b: (C,) bias. Returns same shape as x."""
    B, C, D, H, W = x.shape
    S = D * H * W
    R = B * C
    itemsize = jnp.dtype(x.dtype).itemsize

    x_flat = x.reshape(B, C, S)        # free (contiguous)
    x_rows = x_flat.reshape(R, S)      # free (contiguous): dense-sublane row layout
    b2 = b.reshape(C, 1)

    # ---------------- pass 1: pooled sum + gate ----------------
    c_pad = max(_round_up(C, 8), 8)    # VMEM tile pads sublanes to a multiple of 8
    s_cap_p = max(128, (_TARGET_BLOCK_BYTES // (c_pad * itemsize)) // 128 * 128)
    S_TILE_P = min(_round_up(S, 128), s_cap_p)
    nS_p = pl.cdiv(S, S_TILE_P)

    gate = pl.pallas_call(
        _make_pool_gate_kernel(S=S, S_TILE=S_TILE_P, C=C),
        out_shape=jax.ShapeDtypeStruct((B, C, 1), jnp.float32),
        grid_spec=pltpu.PrefetchScalarGridSpec(
            num_scalar_prefetch=0,
            grid=(B, nS_p),                       # reduction axis last
            in_specs=[
                pl.BlockSpec((1, C, S_TILE_P), lambda bi, si: (bi, 0, si)),
                pl.BlockSpec((C, C), lambda bi, si: (0, 0)),
                pl.BlockSpec((C, 1), lambda bi, si: (0, 0)),
            ],
            out_specs=pl.BlockSpec((1, C, 1), lambda bi, si: (bi, 0, 0)),
            scratch_shapes=[pltpu.VMEM((C, 1), jnp.float32)],
        ),
        compiler_params=pltpu.CompilerParams(
            dimension_semantics=("parallel", "arbitrary"),
        ),
    )(x_flat, w, b2)                               # (B, C, 1) f32
    gate_rows = gate.reshape(R, 1)

    # ---------------- pass 2: broadcast gate over spatial positions ----------------
    S_TILE = min(_round_up(S, 128), 16384)
    r_cap = max(8, (_TARGET_BLOCK_BYTES // (S_TILE * itemsize)) // 8 * 8)
    R_TILE = min(_round_up(R, 8), r_cap)
    nR = pl.cdiv(R, R_TILE)
    nS = pl.cdiv(S, S_TILE)

    out_rows = pl.pallas_call(
        _scale_kernel,
        out_shape=jax.ShapeDtypeStruct((R, S), x.dtype),
        grid_spec=pltpu.PrefetchScalarGridSpec(
            num_scalar_prefetch=0,
            grid=(nR, nS),
            in_specs=[
                pl.BlockSpec((R_TILE, 1), lambda ri, si: (ri, 0)),
                pl.BlockSpec((R_TILE, S_TILE), lambda ri, si: (ri, si)),
            ],
            out_specs=pl.BlockSpec((R_TILE, S_TILE), lambda ri, si: (ri, si)),
        ),
        compiler_params=pltpu.CompilerParams(
            dimension_semantics=("parallel", "parallel"),   # megacore on both axes
        ),
    )(gate_rows, x_rows)

    return out_rows.reshape(B, C, D, H, W)


def _reference(x, w, b):
    # Pure-JAX reference mirroring the PyTorch forward.
    pooled = jnp.mean(x, axis=(2, 3, 4), keepdims=True)            # (B, C, 1, 1, 1)
    g = jnp.einsum("oc,bcijk->boijk", w, pooled) + b.reshape(1, -1, 1, 1, 1)
    gate = jax.nn.sigmoid(g)
    return gate * x


if __name__ == "__main__":
    key = jax.random.PRNGKey(0)
    k_x, k_w, k_b = jax.random.split(key, 3)

    B, C, D, H, W = 2, 4, 4, 8, 8
    x = jax.random.normal(k_x, (B, C, D, H, W), dtype=jnp.float32)

    # Deterministic "Conv3d(ch, ch, 1)" parameters (fan_in = C, torch-default-like uniform).
    bound = 1.0 / (C ** 0.5)
    w = jax.random.uniform(k_w, (C, C), minval=-bound, maxval=bound, dtype=jnp.float32)
    b = jax.random.uniform(k_b, (C,), minval=-bound, maxval=bound, dtype=jnp.float32)

    out = simplified_channel_attention(x, w, b)
    out = jax.block_until_ready(out)
    ref = _reference(x, w, b)
    assert out.shape == x.shape
    assert jnp.allclose(out, ref, atol=1e-5, rtol=1e-5), "mismatch vs reference (aligned S)"

    # Second shape exercises the masked / partial S-tile path (S = 3*5*7 = 105, not % 128).
    x2 = jax.random.normal(k_x, (B, C, 3, 5, 7), dtype=jnp.float32)
    out2 = jax.block_until_ready(simplified_channel_attention(x2, w, b))
    ref2 = _reference(x2, w, b)
    assert jnp.allclose(out2, ref2, atol=1e-5, rtol=1e-5), "mismatch vs reference (masked tail)"

    print("KERNEL_OK")
</pallas_src>

<mosaic_0001>
module attributes {stable_mosaic.version = 11 : i64} {
  func.func @kernel(%arg0: i32, %arg1: i32, %arg2: memref<1x4x256xf32, #tpu.memory_space<vmem>>, %arg3: memref<4x4xf32, #tpu.memory_space<vmem>>, %arg4: memref<4x1xf32, #tpu.memory_space<vmem>>, %arg5: memref<1x4x1xf32, #tpu.memory_space<vmem>>, %arg6: memref<4x1xf32, #tpu.memory_space<vmem>>) attributes {dimension_semantics = [#tpu.dimension_semantics<parallel>, #tpu.dimension_semantics<arbitrary>], iteration_bounds = array<i64: 2, 1>, scalar_prefetch = 0 : i64, scratch_operands = 1 : i64, tpu.core_type = #tpu.core_type<tc>, window_params = [{transform_indices = @transform_0, window_bounds = array<i64: 1, 4, 256>}, {pipeline_mode = #tpu.pipeline_mode<synchronous>, transform_indices = @transform_1, window_bounds = array<i64: 4, 4>}, {pipeline_mode = #tpu.pipeline_mode<synchronous>, transform_indices = @transform_2, window_bounds = array<i64: 4, 1>}, {transform_indices = @transform_3, window_bounds = array<i64: 1, 4, 1>}]} {
    %c0_i32 = arith.constant 0 : i32
    %0 = arith.cmpi eq, %arg1, %c0_i32 : i32
    %1 = arith.extui %0 : i1 to i32
    %c0_i32_0 = arith.constant 0 : i32
    %2 = arith.cmpi ne, %1, %c0_i32_0 : i32
    scf.if %2 {
      %cst_9 = arith.constant 0.000000e+00 : f32
      %13 = vector.broadcast %cst_9 : f32 to vector<4x1xf32>
      %c0_10 = arith.constant 0 : index
      %c0_11 = arith.constant 0 : index
      %14 = vector.load %arg6[%c0_10, %c0_11] : memref<4x1xf32, #tpu.memory_space<vmem>>, vector<4x1xf32>
      tpu.vector_store %arg6[%c0_10, %c0_11], %13 {strides = array<i32>} : memref<4x1xf32, #tpu.memory_space<vmem>>, vector<4x1xf32>,
    } else {
    }
    %c0 = arith.constant 0 : index
    %c0_1 = arith.constant 0 : index
    %c0_2 = arith.constant 0 : index
    %3 = vector.load %arg2[%c0, %c0_1, %c0_2] : memref<1x4x256xf32, #tpu.memory_space<vmem>>, vector<1x4x256xf32>
    %4 = vector.shape_cast %3 : vector<1x4x256xf32> to vector<4x256xf32>
    %c0_3 = arith.constant 0 : index
    %c0_4 = arith.constant 0 : index
    %5 = vector.load %arg6[%c0_3, %c0_4] : memref<4x1xf32, #tpu.memory_space<vmem>>, vector<4x1xf32>
    %cst = arith.constant dense<0.000000e+00> : vector<4xf32>
    %6 = vector.multi_reduction <add>, %4, %cst [1] : vector<4x256xf32> to vector<4xf32>
    %7 = vector.shape_cast %6 : vector<4xf32> to vector<4x1xf32>
    %8 = arith.addf %5, %7 : vector<4x1xf32>
    %c0_5 = arith.constant 0 : index
    %c0_6 = arith.constant 0 : index
    %9 = vector.load %arg6[%c0_5, %c0_6] : memref<4x1xf32, #tpu.memory_space<vmem>>, vector<4x1xf32>
    tpu.vector_store %arg6[%c0_5, %c0_6], %8 {strides = array<i32>} : memref<4x1xf32, #tpu.memory_space<vmem>>, vector<4x1xf32>,
    %c0_i32_7 = arith.constant 0 : i32
    %10 = arith.cmpi eq, %arg1, %c0_i32_7 : i32
    %11 = arith.extui %10 : i1 to i32
    %c0_i32_8 = arith.constant 0 : i32
    %12 = arith.cmpi ne, %11, %c0_i32_8 : i32
    scf.if %12 {
      %c0_9 = arith.constant 0 : index
      %c0_10 = arith.constant 0 : index
      %13 = vector.load %arg6[%c0_9, %c0_10] : memref<4x1xf32, #tpu.memory_space<vmem>>, vector<4x1xf32>
      %cst_11 = arith.constant 3.906250e-03 : f32
      %14 = vector.broadcast %cst_11 : f32 to vector<4x1xf32>
      %15 = arith.mulf %13, %14 : vector<4x1xf32>
      %c0_12 = arith.constant 0 : index
      %c0_13 = arith.constant 0 : index
      %16 = vector.load %arg3[%c0_12, %c0_13] : memref<4x4xf32, #tpu.memory_space<vmem>>, vector<4x4xf32>
      %17 = tpu.transpose %15, [1, 0] : vector<4x1xf32> -> vector<1x4xf32>
      %18 = vector.broadcast %17 : vector<1x4xf32> to vector<4x4xf32>
      %19 = arith.mulf %16, %18 : vector<4x4xf32>
      %cst_14 = arith.constant dense<0.000000e+00> : vector<4xf32>
      %20 = vector.multi_reduction <add>, %19, %cst_14 [1] : vector<4x4xf32> to vector<4xf32>
      %21 = vector.shape_cast %20 : vector<4xf32> to vector<4x1xf32>
      %c0_15 = arith.constant 0 : index
      %c0_16 = arith.constant 0 : index
      %22 = vector.load %arg4[%c0_15, %c0_16] : memref<4x1xf32, #tpu.memory_space<vmem>>, vector<4x1xf32>
      %23 = arith.addf %21, %22 : vector<4x1xf32>
      %24 = arith.negf %23 : vector<4x1xf32>
      %25 = math.exp %24 : vector<4x1xf32>
      %cst_17 = arith.constant 1.000000e+00 : f32
      %26 = vector.broadcast %cst_17 : f32 to vector<4x1xf32>
      %27 = arith.addf %26, %25 : vector<4x1xf32>
      %28 = arith.divf %26, %27 : vector<4x1xf32>
      %29 = vector.shape_cast %28 : vector<4x1xf32> to vector<1x4x1xf32>
      %c0_18 = arith.constant 0 : index
      %c0_19 = arith.constant 0 : index
      %c0_20 = arith.constant 0 : index
      %30 = vector.load %arg5[%c0_18, %c0_19, %c0_20] : memref<1x4x1xf32, #tpu.memory_space<vmem>>, vector<1x4x1xf32>
      tpu.vector_store %arg5[%c0_18, %c0_19, %c0_20], %29 {strides = array<i32>} : memref<1x4x1xf32, #tpu.memory_space<vmem>>, vector<1x4x1xf32>,
    } else {
    }
    return
  }
  func.func @transform_0(%arg0: i32, %arg1: i32) -> (i32, i32, i32) {
    %c0_i32 = arith.constant 0 : i32
    %c0_i32_0 = arith.constant 0 : i32
    return %arg0, %c0_i32, %arg1 : i32, i32, i32
  }
  func.func @transform_1(%arg0: i32, %arg1: i32) -> (i32, i32) {
    %c0_i32 = arith.constant 0 : i32
    %c0_i32_0 = arith.constant 0 : i32
    %c0_i32_1 = arith.constant 0 : i32
    return %c0_i32, %c0_i32_0 : i32, i32
  }
  func.func @transform_2(%arg0: i32, %arg1: i32) -> (i32, i32) {
    %c0_i32 = arith.constant 0 : i32
    %c0_i32_0 = arith.constant 0 : i32
    %c0_i32_1 = arith.constant 0 : i32
    return %c0_i32, %c0_i32_0 : i32, i32
  }
  func.func @transform_3(%arg0: i32, %arg1: i32) -> (i32, i32, i32) {
    %c0_i32 = arith.constant 0 : i32
    %c0_i32_0 = arith.constant 0 : i32
    %c0_i32_1 = arith.constant 0 : i32
    return %arg0, %c0_i32, %c0_i32_0 : i32, i32, i32
  }
}

</mosaic_0001>

<bundles_post_ra>
// kernel: tpu_custom_call.1
= control target key start
LH: loop header
LB: loop body
LE: loop exit
PB: predicated region body
PF: predicated region fallthrough
CT: control target
= control target key end

     0   :  { %8 = vsyncpa [#allocation4], 0  ;;  %s642_s0 = inlined_call_operand.hbm [shape: f32[2,4,256], index: 0, kind: input, shape index: {}]   ;;  %s643_s1 = inlined_call_operand.vmem [shape: f32[4,4], index: 1, kind: input, shape index: {}]   ;;  %s644_s2 = inlined_call_operand.vmem [shape: f32[4,1], index: 2, kind: input, shape index: {}]   ;;  %s645_s3 = inlined_call_operand.vmem [shape: f32[2,4,1], index: 3, kind: output, shape index: {}]  }
   0x1   :  { %10 = vsyncpa [#allocation4 + $0x1], 0  ;;  %s533_s12 = smov 0   ;;  %s535_s13 = smov 0  }
   0x2   :  { %s537_s14 = smov 0   ;;  %s539_s15 = smov 0  }
   0x3   :  { %s541_s16 = smov 0   ;;  %s543_s17 = smov 0  }
   0x4 LB: > { %s356_s18 = sadd.s32 4294967295, %s509_s17   ;;  %s28_s19 = sadd.s32 1, %s505_s16  ;;  %s509_s17 = sphi %s543_s17, %s16_s17   ;;  %s505_s16 = sphi %s541_s16, %s653_s16   ;;  %s501_s15 = sphi %s539_s15, %s652_s15   ;;  %s497_s14 = sphi %s537_s14, %s651_s14   ;;  %s493_s13 = sphi %s535_s13, %s650_s13   ;;  %s489_s12 = sphi %s533_s12, %s649_s12  }
   0x5   : > { %p30_p0 = scmp.ge.s32.totalorder %s28_s19, 2  ;;  %s37_s20 = sadd.s32 1, %s497_s14 }
   0x6   : > { %p44_p1 = scmp.ne.s32.totalorder %s497_s14, %s493_s13  ;;  %p45_p2 = scmp.eq.s32.totalorder %s509_s17, 0 }
   0x7   : > { %s655_s19 = smov (%p30_p0, %s28_s19), 0  ;;  %p50_p4 = scmp.ne.s32.totalorder %s493_s13, %s489_s12 }
   0x8   : > { %p569_p3 = por %p45_p2, %p44_p1  ;;  %s32_s22 = ssub.s32 %s505_s16, %s655_s19 }
   0x9   : > { %p51_p5 = scmp.eq.s32.totalorder %s356_s18, 0  ;;  %p35_p6 = scmp.eq.s32.totalorder %s32_s22, 0 }
   0xa   : > { %p376_p8 = scmp.lt.s32.totalorder %s509_s17, 2  ;;  %s148_s25 = sand.u32 1, %s497_s14  }
   0xb   : > { %p576_p7 = por %p51_p5, %p50_p4  ;;  %s369_s26 = sshll.u32 %s505_s16, 7 }
   0xc   : > { %s582_s24 = scalar_select %p35_p6, %s497_s14, %s37_s20  }
   0xd   : > { %s360_s27 = sshll.u32 %s148_s25, 3  ;;  %s160_s30 = scalar_lea.hbm %s642_s0, %s369_s26 }
   0xe   : > { %s152_s4 = scalar_lea.vmem [#allocation3], %s360_s27  ;;  %p591_p9 = pnand %p376_p8, %p569_p3 }
   0xf   : > { %s162_s5 = sshll.u32 %s152_s4, 4  ;;  %p363_p10 = scmp.ge.s32.totalorder %s509_s17, 1  ;;  %s163_s5 = int_to_ptr.vmem [resolvable:$true] %s162_s5 }
  0x10   : > { %p167_p11 = scmp.lt.s32.totalorder %s509_s17, 3  ;;  %s149_s7 = scalar_lea.sflag [#allocation4], %s148_s25 }
  0x11   : > { %p433_p12 = pneg %p591_p9  ;;  %s444_s8 = scalar_lea.vmem %s163_s5, 128 }
  0x12   : > { %p445_p13 = scmp.ne.s32.totalorder %s163_s5, %s444_s8  ;;  %s511_s9 = smov [#allocation3]  }
  0x13   : > { %s449_s10 = sshll.u32 %s511_s9, 4  ;;  %s450_s10 = int_to_ptr.vmem [resolvable:$false] %s449_s10 }
  0x14   : > { %p447_p0 = pnand %p445_p13, %p433_p12  ;;  %s451_s11 = scalar_lea.vmem %s450_s10, 256 }
  0x15   : > { %p452_p2 = scmp.lt.s32.totalorder %s163_s5, %s450_s10  ;;  %p453_p3 = scmp.lt.s32.totalorder %s451_s11, %s444_s8 }
  0x16   : > { %p448_p1 = pneg %p447_p0 }
  0x17   : > { %p454_p4 = por %p453_p3, %p452_p2 }
  0x19   : > { %p455_p5 = pnand %p454_p4, %p448_p1 }
  0x1b   : > { %458 = shalt.err (!%p455_p5)
}
  0x1c   : > { %375 = dma.hbm_to_vmem [thread:$0]  (!%p591_p9), %s160_s30, 128, %s163_s5, %s149_s7  }
  0x1d   : > { %p168_p6 = pnand %p363_p10, %p167_p11 }
  0x1e   : > { %s173_s12 = sand.u32 (!%p168_p6), 1, %s493_s13  }
  0x1f   : > { %171 = sbr.rel (%p168_p6) target bundleno = 496 (0x1f0), region = 32  ;;  %s364_s18 = sshll.u32 (!%p168_p6), %s173_s12, 3 }
  0x20   : > { %s174_s20 = scalar_lea.sflag (!%p168_p6), [#allocation4], %s173_s12  ;;  %s177_s21 = scalar_lea.vmem (!%p168_p6), [#allocation3], %s364_s18 }
  0x24   : > { %484 = dma.done.wait (%p576_p7), %s174_s20, 128  }
  0x25   : > { %486 = vsyncadd (%p576_p7), %s174_s20, 4294967168  ;;  %vm208_vm0 = vcmask 3072   ;;  %v512_v0 = vmov 0.0   ;;  %vm215_vm1 = vcmask 1043456   ;;  %v210_v1 = vld [vmem:[%s177_s21] sm:$0xff]  ;;  %v262_v11 = vlaneseq  ;;  %p200_p7 = scmp.lt.s32.totalorder %s501_s15, 1 }
  0x26   : > { %209 = vst.msk [vmem:[#allocation2] sm:$0xf] %vm208_vm0, %v512_v0  ;;  %v213_v2 = vcombine.high %v210_v1, %v210_v1  ;;  %v216_v3 = vsel %vm215_vm1, %v210_v1, 0.0  ;;  %v229_v15 = vld [vmem:[%s643_s1] sm:$0xf]  ;;  %vm267_vm2 = vcmask 27648  }
  0x27   : > { %v263_v12 = vshrl.u32 %v262_v11, 7  ;;  %v271_v19 = vld [vmem:[%s644_s2] sm:$0xf]  ;;  %s657_s15 = smov (!%p200_p7, %s501_s15), 1 }
  0x28   : > { %v217_v4 = vsel %vm215_vm1, %v213_v2, 0.0  ;;  %s365_s27 = sshll.u32 %s657_s15, 2 }
  0x29   : > { %v218_v5 = vadd.f32 %v217_v4, %v216_v3  ;;  %v264_v13 = vsub.s32 0, %v263_v12  ;;  %s203_s30 = scalar_lea.vmem %s645_s3, %s365_s27 }
  0x2b   : > { %219 = vadd.xlane.f32.xlu0 %v218_v5 }
  0x2d   : > { %v211_v6 = vld [vmem:[#allocation2] sm:$0xf] }
  0xb4   : > { %v220_v7 = vpop.xlane.xlu0 %219 }
  0xb5   : > { %v221_v8 = vadd.f32 %v220_v7, %v211_v6 }
  0xb7   : > { %223 = vst.msk [vmem:[#allocation2] sm:$0xf] %vm208_vm0, %v221_v8 }
  0xbe   : > { %v227_v9 = vld [vmem:[#allocation2] sm:$0xf] }
  0xbf   : > { %v228_v10 = vmul.f32 0.00390625, %v227_v9 }
  0xc1   : > { %230 = vxpose.xlu0.b32.start.end [1/1] (short) (narrow) %v228_v10, 8 }
 0x13d   : > { %v246_v14 = vpop.trf.xlu0 }
 0x13e   : > { %v265_v16 = vrot.slane %v246_v14, %v264_v13 }
 0x140   : > { %v266_v17 = vmul.f32 %v265_v16, %v229_v15 }
 0x142   : > { %v268_v18 = vsel %vm267_vm2, %v266_v17, 0.0 }
 0x143   : > { %269 = vadd.xlane.f32.xlu1 %v268_v18 }
 0x1cc   : > { %v270_v20 = vpop.xlane.xlu1 %269 }
 0x1cd   : > { %v272_v21 = vadd.f32 %v271_v19, %v270_v20 }
 0x1cf   : > { %v366_v22 = vmul.f32 -1.442695, %v272_v21 }
 0x1d1   : > { %427 = vpow2.f32 %v366_v22 }
 0x1de   : > { %v428_v23 = vpop.eup %427 }
 0x1df   : > { %v276_v24 = vadd.f32 1.0, %v428_v23 }
 0x1e1   : > { %429 = vrcp.f32 %v276_v24 }
 0x1ee   : > { %v430_v25 = vpop.eup %429 }
 0x1ef   : > { %279 = vst.msk [vmem:[%s203_s30] sm:$0xf] %vm208_vm0, %v430_v25 }
 0x1f0 PF: > { %s16_s17 = sadd.s32 1, %s509_s17   ;;  %s649_s12 = smov %s493_s13 }
 0x1f1   : > { %p13_p8 = scmp.ge.s32.totalorder %s16_s17, 4   ;;  %s650_s13 = smov %s497_s14 }
 0x1f2   : > { %s651_s14 = smov %s582_s24  ;;  %s652_s15 = smov %s505_s16 }
 0x1f3   : > { %s653_s16 = smov %s655_s19  ;;  %15 = sbr.rel (!%p13_p8) target bundleno = 4 (0x4), region = 80 }
 0x1f8   :  { %299 = vsyncpa [#allocation4], 1 }
 0x1f9   :  { %301 = vsyncpa [#allocation4 + $0x1], 1 }

</bundles_post_ra>
